<compile_context>
chip_gen: v6e
topology: v6e:2x2x1
jax: 0.10.0
libtpu: 0.0.40
codegen_flags: <defaults>
</compile_context>

<pallas_src>
import functools
import math

import jax
import jax.numpy as jnp
from jax import lax
from jax.experimental import pallas as pl
from jax.experimental.pallas import tpu as pltpu

_LN_EPS = 1e-5
_MASK_BIAS = -1e30  # finite additive key-padding bias (matches masked_fill(-inf) after softmax)


def _layer_norm(x, gamma, beta, eps=_LN_EPS):
    mu = jnp.mean(x, axis=-1, keepdims=True)
    var = jnp.mean(jnp.square(x - mu), axis=-1, keepdims=True)
    return (x - mu) * lax.rsqrt(var + eps) * gamma + beta


# ------------------- kernel 1: out = LayerNorm(features) + pos ----------------

def _ln_pos_kernel(x_ref, pos_ref, g_ref, b_ref, o_ref):
    x = x_ref[0].astype(jnp.float32)                      # (S, D)
    y = _layer_norm(x, g_ref[...], b_ref[...]) + pos_ref[...]
    o_ref[0] = y.astype(o_ref.dtype)


def ln_plus_pos(x, pos, gamma, beta):
    B, S, D = x.shape
    return pl.pallas_call(
        _ln_pos_kernel,
        grid=(B,),
        in_specs=[
            pl.BlockSpec((1, S, D), lambda b: (b, 0, 0)),
            pl.BlockSpec((S, D), lambda b: (0, 0)),        # constant index: stays resident
            pl.BlockSpec((1, D), lambda b: (0, 0)),
            pl.BlockSpec((1, D), lambda b: (0, 0)),
        ],
        out_specs=pl.BlockSpec((1, S, D), lambda b: (b, 0, 0)),
        out_shape=jax.ShapeDtypeStruct((B, S, D), x.dtype),
        compiler_params=pltpu.CompilerParams(dimension_semantics=("parallel",)),
    )(x, pos, gamma.reshape(1, D), beta.reshape(1, D))


# -------- kernel 2: fused MHA layer = LN(x + Wo @ MHA(x@Wqkv) ) per batch ------

def _mha_layer_kernel(x_ref, bias_ref, wqkv_ref, bqkv_ref, wo_ref, bo_ref,
                      g_ref, b_ref, o_ref, *, n_heads, d_k, d_v):
    x = x_ref[0].astype(jnp.float32)                       # (S, D)
    # one fused QKV projection (single MXU matmul instead of three launches)
    qkv = jnp.dot(x, wqkv_ref[...], preferred_element_type=jnp.float32) + bqkv_ref[...]
    hdk = n_heads * d_k
    bias = bias_ref[0]                                     # (1, S) additive key-padding bias

    heads = []
    for h in range(n_heads):                               # static unroll: all heads, one launch
        qh = qkv[:, h * d_k:(h + 1) * d_k]                 # 1/sqrt(d_k) already folded into wq
        kh = qkv[:, hdk + h * d_k: hdk + (h + 1) * d_k]
        vh = qkv[:, 2 * hdk + h * d_v: 2 * hdk + (h + 1) * d_v]
        s = lax.dot_general(qh, kh, (((1,), (1,)), ((), ())),   # q @ k.T  -> (S, S)
                            preferred_element_type=jnp.float32)
        s = s + bias
        s = s - jnp.max(s, axis=-1, keepdims=True)
        p = jnp.exp(s)
        p = p / jnp.sum(p, axis=-1, keepdims=True)
        heads.append(jnp.dot(p, vh, preferred_element_type=jnp.float32))
    att = jnp.concatenate(heads, axis=-1)                  # (S, H*d_v)

    # output projection + residual + LayerNorm epilogue, all fused in VMEM
    y = jnp.dot(att, wo_ref[...], preferred_element_type=jnp.float32) + bo_ref[...]
    o_ref[0] = _layer_norm(x + y, g_ref[...], b_ref[...]).astype(o_ref.dtype)


def mha_layer(x, mask_bias, wqkv, bqkv, wo, bo, gamma, beta, *, n_heads, d_k, d_v):
    B, S, D = x.shape
    n_qkv = wqkv.shape[1]
    hdv = n_heads * d_v
    return pl.pallas_call(
        functools.partial(_mha_layer_kernel, n_heads=n_heads, d_k=d_k, d_v=d_v),
        grid=(B,),
        in_specs=[
            pl.BlockSpec((1, S, D), lambda b: (b, 0, 0)),
            pl.BlockSpec((1, 1, S), lambda b: (b, 0, 0)),
            pl.BlockSpec((D, n_qkv), lambda b: (0, 0)),    # weights: constant block index
            pl.BlockSpec((1, n_qkv), lambda b: (0, 0)),
            pl.BlockSpec((hdv, D), lambda b: (0, 0)),
            pl.BlockSpec((1, D), lambda b: (0, 0)),
            pl.BlockSpec((1, D), lambda b: (0, 0)),
            pl.BlockSpec((1, D), lambda b: (0, 0)),
        ],
        out_specs=pl.BlockSpec((1, S, D), lambda b: (b, 0, 0)),
        out_shape=jax.ShapeDtypeStruct((B, S, D), x.dtype),
        compiler_params=pltpu.CompilerParams(dimension_semantics=("parallel",)),
    )(x, mask_bias, wqkv, bqkv.reshape(1, n_qkv), wo, bo.reshape(1, D),
      gamma.reshape(1, D), beta.reshape(1, D))


# ----------- kernel 3: fused FFN layer = LN(x + relu(x@w1+b1)@w2+b2) -----------

def _ffn_layer_kernel(x_ref, w1_ref, b1_ref, w2_ref, b2_ref, g_ref, b_ref, o_ref):
    x = x_ref[...].astype(jnp.float32)                     # (TM, D)
    h = jnp.dot(x, w1_ref[...], preferred_element_type=jnp.float32) + b1_ref[...]
    h = jnp.maximum(h, 0.0)                                # d_ff activation never leaves VMEM
    y = jnp.dot(h, w2_ref[...], preferred_element_type=jnp.float32) + b2_ref[...]
    o_ref[...] = _layer_norm(x + y, g_ref[...], b_ref[...]).astype(o_ref.dtype)


def _row_tile(M):
    if M <= 8 or M % 8 != 0:
        return M
    return min(128, max(8, (M // 2) // 8 * 8))


def ffn_layer(x2, w1, b1, w2, b2, gamma, beta):
    M, D = x2.shape
    d_ff = w1.shape[1]
    tm = _row_tile(M)
    return pl.pallas_call(
        _ffn_layer_kernel,
        grid=(pl.cdiv(M, tm),),
        in_specs=[
            pl.BlockSpec((tm, D), lambda i: (i, 0)),
            pl.BlockSpec((D, d_ff), lambda i: (0, 0)),     # weights resident across grid
            pl.BlockSpec((1, d_ff), lambda i: (0, 0)),
            pl.BlockSpec((d_ff, D), lambda i: (0, 0)),
            pl.BlockSpec((1, D), lambda i: (0, 0)),
            pl.BlockSpec((1, D), lambda i: (0, 0)),
            pl.BlockSpec((1, D), lambda i: (0, 0)),
        ],
        out_specs=pl.BlockSpec((tm, D), lambda i: (i, 0)),
        out_shape=jax.ShapeDtypeStruct((M, D), x2.dtype),
        compiler_params=pltpu.CompilerParams(dimension_semantics=("parallel",)),
    )(x2, w1, b1.reshape(1, d_ff), w2, b2.reshape(1, D),
      gamma.reshape(1, D), beta.reshape(1, D))


# ------------------------------ glue (plain JAX) ------------------------------

def sinusoid_pos_embedding(S, D, temperature=10000.0):
    pos = jnp.arange(1, S + 1, dtype=jnp.float32)
    dim_t = jnp.arange(D)
    dim_t = temperature ** ((2 * (dim_t // 2)).astype(jnp.float32) / D)
    ang = pos[:, None] / dim_t[None, :]                                  # (S, D)
    pe = jnp.stack([jnp.sin(ang[:, 0::2]), jnp.cos(ang[:, 1::2])], axis=-1).reshape(S, D)
    return pe


def init_params(key, d_model, n_layers, n_heads, d_k, d_v, d_ff):
    def lin(k, din, dout):
        return (0.02 * jax.random.normal(k, (din, dout), jnp.float32),
                jnp.zeros((dout,), jnp.float32))

    keys = jax.random.split(key, n_layers)
    params = {"ln_g": jnp.ones((d_model,), jnp.float32),
              "ln_b": jnp.zeros((d_model,), jnp.float32),
              "layers": []}
    for i in range(n_layers):
        ks = jax.random.split(keys[i], 6)
        wq, bq = lin(ks[0], d_model, n_heads * d_k)
        wk, bk = lin(ks[1], d_model, n_heads * d_k)
        wv, bv = lin(ks[2], d_model, n_heads * d_v)
        wo, bo = lin(ks[3], n_heads * d_v, d_model)
        w1, b1 = lin(ks[4], d_model, d_ff)
        w2, b2 = lin(ks[5], d_ff, d_model)
        params["layers"].append(dict(
            wq=wq, bq=bq, wk=wk, bk=bk, wv=wv, bv=bv, wo=wo, bo=bo,
            ln1_g=jnp.ones((d_model,), jnp.float32),
            ln1_b=jnp.zeros((d_model,), jnp.float32),
            w1=w1, b1=b1, w2=w2, b2=b2,
            ln2_g=jnp.ones((d_model,), jnp.float32),
            ln2_b=jnp.zeros((d_model,), jnp.float32)))
    return params


def encoder_forward(params, features, padding_mask, *, n_heads, d_k, d_v):
    B, S, D = features.shape
    scale = 1.0 / math.sqrt(d_k)
    pos = sinusoid_pos_embedding(S, D).astype(features.dtype)
    mask_bias = (padding_mask.astype(jnp.float32) * _MASK_BIAS).reshape(B, 1, S)

    # out = LayerNorm(features) + pos_embedding(features)
    out = ln_plus_pos(features, pos, params["ln_g"], params["ln_b"])

    for lp in params["layers"]:
        # fold 1/sqrt(d_k) into the Q projection, concatenate Q|K|V weights once
        wqkv = jnp.concatenate([lp["wq"] * scale, lp["wk"], lp["wv"]], axis=1)
        bqkv = jnp.concatenate([lp["bq"] * scale, lp["bk"], lp["bv"]], axis=0)
        out = mha_layer(out, mask_bias, wqkv, bqkv, lp["wo"], lp["bo"],
                        lp["ln1_g"], lp["ln1_b"], n_heads=n_heads, d_k=d_k, d_v=d_v)
        out = ffn_layer(out.reshape(B * S, D), lp["w1"], lp["b1"], lp["w2"], lp["b2"],
                        lp["ln2_g"], lp["ln2_b"]).reshape(B, S, D)
    return out


# ------------------------------ pure-JAX reference ----------------------------

def _ref_ln(x, g, b, eps=_LN_EPS):
    mu = jnp.mean(x, axis=-1, keepdims=True)
    var = jnp.mean(jnp.square(x - mu), axis=-1, keepdims=True)
    return (x - mu) * lax.rsqrt(var + eps) * g + b


def ref_forward(params, features, padding_mask, *, n_heads, d_k, d_v):
    B, S, D = features.shape
    out = _ref_ln(features, params["ln_g"], params["ln_b"]) + sinusoid_pos_embedding(S, D)[None]
    mask4 = padding_mask.astype(jnp.float32).reshape(B, 1, 1, S)
    for lp in params["layers"]:
        q = (out @ lp["wq"] + lp["bq"]).reshape(B, S, n_heads, d_k).transpose(0, 2, 1, 3)
        k = (out @ lp["wk"] + lp["bk"]).reshape(B, S, n_heads, d_k).transpose(0, 2, 1, 3)
        v = (out @ lp["wv"] + lp["bv"]).reshape(B, S, n_heads, d_v).transpose(0, 2, 1, 3)
        s = jnp.einsum("bhqd,bhkd->bhqk", q, k) / math.sqrt(d_k)
        s = jnp.where(mask4 > 0.0, -jnp.inf, s)
        s = s - jnp.max(s, axis=-1, keepdims=True)
        p = jnp.exp(s)
        p = p / jnp.sum(p, axis=-1, keepdims=True)
        att = jnp.einsum("bhqk,bhkd->bhqd", p, v).transpose(0, 2, 1, 3).reshape(B, S, n_heads * d_v)
        att = att @ lp["wo"] + lp["bo"]
        out = _ref_ln(out + att, lp["ln1_g"], lp["ln1_b"])
        ff = jnp.maximum(out @ lp["w1"] + lp["b1"], 0.0) @ lp["w2"] + lp["b2"]
        out = _ref_ln(out + ff, lp["ln2_g"], lp["ln2_b"])
    return out


# ---------------------------------- main --------------------------------------

if __name__ == "__main__":
    B, S = 2, 8
    D_MODEL, HEADS, D_K, D_V, D_FF, LAYERS = 32, 4, 8, 8, 64, 2

    key = jax.random.PRNGKey(0)
    k_feat, k_params = jax.random.split(key)
    features = jax.random.normal(k_feat, (B, S, D_MODEL), jnp.float32)
    # last two key positions of batch 1 are padding
    padding_mask = jnp.zeros((B, S), jnp.float32).at[1, -2:].set(1.0)

    params = init_params(k_params, D_MODEL, LAYERS, HEADS, D_K, D_V, D_FF)

    out = encoder_forward(params, features, padding_mask,
                          n_heads=HEADS, d_k=D_K, d_v=D_V)
    out = jax.block_until_ready(out)

    ref = ref_forward(params, features, padding_mask,
                      n_heads=HEADS, d_k=D_K, d_v=D_V)

    assert out.shape == (B, S, D_MODEL)
    assert bool(jnp.all(jnp.isfinite(out)))
    assert bool(jnp.allclose(out, ref, atol=2e-4, rtol=2e-4)), \
        float(jnp.max(jnp.abs(out - ref)))
    print("KERNEL_OK")
</pallas_src>

<mosaic_0001>
module attributes {stable_mosaic.version = 11 : i64} {
  func.func @_ln_pos_kernel(%arg0: i32, %arg1: memref<1x8x32xf32, #tpu.memory_space<vmem>>, %arg2: memref<8x32xf32, #tpu.memory_space<vmem>>, %arg3: memref<1x32xf32, #tpu.memory_space<vmem>>, %arg4: memref<1x32xf32, #tpu.memory_space<vmem>>, %arg5: memref<1x8x32xf32, #tpu.memory_space<vmem>>) attributes {dimension_semantics = [#tpu.dimension_semantics<parallel>], iteration_bounds = array<i64: 2>, scalar_prefetch = 0 : i64, scratch_operands = 0 : i64, tpu.core_type = #tpu.core_type<tc>, window_params = [{transform_indices = @transform_0, window_bounds = array<i64: 1, 8, 32>}, {pipeline_mode = #tpu.pipeline_mode<synchronous>, transform_indices = @transform_1, window_bounds = array<i64: 8, 32>}, {pipeline_mode = #tpu.pipeline_mode<synchronous>, transform_indices = @transform_2, window_bounds = array<i64: 1, 32>}, {pipeline_mode = #tpu.pipeline_mode<synchronous>, transform_indices = @transform_3, window_bounds = array<i64: 1, 32>}, {transform_indices = @transform_4, window_bounds = array<i64: 1, 8, 32>}]} {
    %c0 = arith.constant 0 : index
    %c0_0 = arith.constant 0 : index
    %c0_1 = arith.constant 0 : index
    %0 = vector.load %arg1[%c0, %c0_0, %c0_1] : memref<1x8x32xf32, #tpu.memory_space<vmem>>, vector<1x8x32xf32>
    %1 = vector.shape_cast %0 : vector<1x8x32xf32> to vector<8x32xf32>
    %c0_2 = arith.constant 0 : index
    %c0_3 = arith.constant 0 : index
    %2 = vector.load %arg3[%c0_2, %c0_3] : memref<1x32xf32, #tpu.memory_space<vmem>>, vector<1x32xf32>
    %c0_4 = arith.constant 0 : index
    %c0_5 = arith.constant 0 : index
    %3 = vector.load %arg4[%c0_4, %c0_5] : memref<1x32xf32, #tpu.memory_space<vmem>>, vector<1x32xf32>
    %cst = arith.constant dense<0.000000e+00> : vector<8xf32>
    %4 = vector.multi_reduction <add>, %1, %cst [1] : vector<8x32xf32> to vector<8xf32>
    %5 = vector.shape_cast %4 : vector<8xf32> to vector<8x1xf32>
    %cst_6 = arith.constant 3.200000e+01 : f32
    %6 = vector.broadcast %cst_6 : f32 to vector<8x1xf32>
    %7 = arith.divf %5, %6 : vector<8x1xf32>
    %8 = vector.broadcast %7 : vector<8x1xf32> to vector<8x32xf32>
    %9 = arith.subf %1, %8 : vector<8x32xf32>
    %10 = arith.mulf %9, %9 : vector<8x32xf32>
    %cst_7 = arith.constant dense<0.000000e+00> : vector<8xf32>
    %11 = vector.multi_reduction <add>, %10, %cst_7 [1] : vector<8x32xf32> to vector<8xf32>
    %12 = vector.shape_cast %11 : vector<8xf32> to vector<8x1xf32>
    %cst_8 = arith.constant 3.200000e+01 : f32
    %13 = vector.broadcast %cst_8 : f32 to vector<8x1xf32>
    %14 = arith.divf %12, %13 : vector<8x1xf32>
    %15 = vector.broadcast %7 : vector<8x1xf32> to vector<8x32xf32>
    %16 = arith.subf %1, %15 : vector<8x32xf32>
    %cst_9 = arith.constant 9.99999974E-6 : f32
    %17 = vector.broadcast %cst_9 : f32 to vector<8x1xf32>
    %18 = arith.addf %14, %17 : vector<8x1xf32>
    %19 = math.rsqrt %18 : vector<8x1xf32>
    %20 = vector.broadcast %19 : vector<8x1xf32> to vector<8x32xf32>
    %21 = arith.mulf %16, %20 : vector<8x32xf32>
    %22 = vector.broadcast %2 : vector<1x32xf32> to vector<8x32xf32>
    %23 = arith.mulf %21, %22 : vector<8x32xf32>
    %24 = vector.broadcast %3 : vector<1x32xf32> to vector<8x32xf32>
    %25 = arith.addf %23, %24 : vector<8x32xf32>
    %c0_10 = arith.constant 0 : index
    %c0_11 = arith.constant 0 : index
    %26 = vector.load %arg2[%c0_10, %c0_11] : memref<8x32xf32, #tpu.memory_space<vmem>>, vector<8x32xf32>
    %27 = arith.addf %25, %26 : vector<8x32xf32>
    %c0_12 = arith.constant 0 : index
    %c0_13 = arith.constant 0 : index
    %c0_14 = arith.constant 0 : index
    %28 = vector.load %arg5[%c0_12, %c0_13, %c0_14] : memref<1x8x32xf32, #tpu.memory_space<vmem>>, vector<1x8x32xf32>
    %29 = vector.shape_cast %28 : vector<1x8x32xf32> to vector<8x32xf32>
    %30 = vector.shape_cast %27 : vector<8x32xf32> to vector<1x8x32xf32>
    tpu.vector_store %arg5[%c0_12, %c0_13, %c0_14], %30 {strides = array<i32>} : memref<1x8x32xf32, #tpu.memory_space<vmem>>, vector<1x8x32xf32>,
    return
  }
  func.func @transform_0(%arg0: i32) -> (i32, i32, i32) {
    %c0_i32 = arith.constant 0 : i32
    %c0_i32_0 = arith.constant 0 : i32
    %c0_i32_1 = arith.constant 0 : i32
    return %arg0, %c0_i32, %c0_i32_0 : i32, i32, i32
  }
  func.func @transform_1(%arg0: i32) -> (i32, i32) {
    %c0_i32 = arith.constant 0 : i32
    %c0_i32_0 = arith.constant 0 : i32
    %c0_i32_1 = arith.constant 0 : i32
    return %c0_i32, %c0_i32_0 : i32, i32
  }
  func.func @transform_2(%arg0: i32) -> (i32, i32) {
    %c0_i32 = arith.constant 0 : i32
    %c0_i32_0 = arith.constant 0 : i32
    %c0_i32_1 = arith.constant 0 : i32
    return %c0_i32, %c0_i32_0 : i32, i32
  }
  func.func @transform_3(%arg0: i32) -> (i32, i32) {
    %c0_i32 = arith.constant 0 : i32
    %c0_i32_0 = arith.constant 0 : i32
    %c0_i32_1 = arith.constant 0 : i32
    return %c0_i32, %c0_i32_0 : i32, i32
  }
  func.func @transform_4(%arg0: i32) -> (i32, i32, i32) {
    %c0_i32 = arith.constant 0 : i32
    %c0_i32_0 = arith.constant 0 : i32
    %c0_i32_1 = arith.constant 0 : i32
    return %arg0, %c0_i32, %c0_i32_0 : i32, i32, i32
  }
}

</mosaic_0001>

<bundles_post_ra>
// kernel: tpu_custom_call.1
= control target key start
LH: loop header
LB: loop body
LE: loop exit
PB: predicated region body
PF: predicated region fallthrough
CT: control target
= control target key end

     0   :  { %9 = vsyncpa [#allocation3], 0  ;;  %s757_s0 = inlined_call_operand.hbm [shape: f32[2,8,32], index: 0, kind: input, shape index: {}]   ;;  %s758_s1 = inlined_call_operand.hbm [shape: f32[8,32], index: 1, kind: input, shape index: {}]   ;;  %s759_s2 = inlined_call_operand.vmem [shape: f32[1,32], index: 2, kind: input, shape index: {}]   ;;  %s760_s3 = inlined_call_operand.vmem [shape: f32[1,32], index: 3, kind: input, shape index: {}]   ;;  %s761_s4 = inlined_call_operand.hbm [shape: f32[2,8,32], index: 4, kind: output, shape index: {}]  }
   0x1   :  { %11 = vsyncpa [#allocation3 + $0x1], 0 }
   0x2   :  { %12 = vsyncpa [#allocation6], 0 }
   0x3   :  { %13 = vsyncpa [#allocation4], 0 }
   0x4   :  { %15 = vsyncpa [#allocation4 + $0x1], 0  ;;  %s582_s15 = smov 0   ;;  %s584_s16 = smov 0  }
   0x5   :  { %s586_s17 = smov 0   ;;  %s588_s18 = smov 0  }
   0x6 LB: > { %s603_s19 = sadd.s32 4294967295, %s552_s18   ;;  %s355_s20 = sadd.s32 4294967294, %s552_s18   ;;  %s552_s18 = sphi %s588_s18, %s784_s18   ;;  %s548_s17 = sphi %s586_s17, %s783_s17   ;;  %s544_s16 = sphi %s584_s16, %s782_s16   ;;  %s540_s15 = sphi %s582_s15, %s781_s15  }
   0x7   : > { %p41_p0 = scmp.ne.s32.totalorder %s544_s16, %s540_s15  ;;  %p762_p1 = scmp.eq.s32.totalorder %s603_s19, 0 }
   0x8   : > { %p134_p3 = scmp.eq.s32.totalorder %s355_s20, 1  ;;  %p356_p5 = scmp.ge.s32.totalorder %s552_s18, 1 }
   0x9   : > { %p612_p4 = por %p762_p1, %p41_p0  ;;  %p141_p7 = scmp.lt.s32.totalorder %s552_s18, 3 }
   0xa   : > { %p617_p6 = por %p134_p3, %p41_p0  ;;  %s554_s24 = smov [#allocation5]  }
   0xb   : > { %s766_s21 = scalar_select %p612_p4, 1, 0 }
   0xc   : > { %s767_s22 = scalar_select %p617_p6, 1, 0 }
   0xd   : > { %p622_p8 = pnand %p356_p5, %p141_p7  ;;  %s154_s25 = sshll.u32 %s554_s24, 4  ;;  %s155_s25 = int_to_ptr.vmem [resolvable:$true] %s154_s25 }
   0xe   : > { %s630_s26 = sadd.s32 1, %s552_s18   ;;  %s28_s30 = sadd.s32 1, %s548_s17 }
   0xf   : > { %s768_s23 = scalar_select %p622_p8, 1, 0 }
  0x10   : > { %p379_p10 = pneg %p622_p8  ;;  %s25_s28 = ssub.s32 %s552_s18, %s630_s26 }
  0x11   : > { %p640_p12 = scmp.eq.s32.totalorder %s25_s28, 0  ;;  %p35_p13 = scmp.ne.s32.totalorder %s548_s17, %s544_s16 }
  0x12   : > { %p634_p11 = pnand %p379_p10, %p762_p1  ;;  %s441_s5 = scalar_lea.vmem %s155_s25, 128 }
  0x13   : > { %p442_p3 = scmp.ne.s32.totalorder %s155_s25, %s441_s5  ;;  %p449_p9 = scmp.lt.s32.totalorder %s155_s25, %s155_s25 }
  0x14   : > { %p432_p0 = pneg %p634_p11  ;;  %p450_p2 = scmp.lt.s32.totalorder %s441_s5, %s441_s5 }
  0x16   : > { %p444_p5 = pnand %p442_p3, %p432_p0  ;;  %p451_p10 = por %p450_p2, %p449_p9 }
  0x18   : > { %p445_p7 = pneg %p444_p5 }
  0x1a   : > { %p452_p1 = pnand %p451_p10, %p445_p7 }
  0x1c   : > { %455 = shalt.err (!%p452_p1)
}
  0x1d   : > { %382 = dma.hbm_to_vmem [thread:$0]  (!%p634_p11), %s758_s1, 128, %s155_s25, [#allocation6]  }
  0x1e   : > { %s657_s8 = scalar_select %p640_p12, %s548_s17, %s28_s30  }
  0x1f   : > { %p36_p1 = scmp.eq.s32.totalorder %s552_s18, 0  ;;  %p771_p2 = scmp.eq.s32.totalorder %s603_s19, 1 }
  0x20   : > { %p392_p0 = scmp.lt.s32.totalorder %s552_s18, 2  ;;  %s171_s10 = sand.u32 1, %s548_s17  }
  0x21   : > { %p665_p9 = por %p771_p2, %p35_p13  ;;  %p37_p3 = por %p36_p1, %p35_p13 }
  0x22   : > { %s359_s11 = sshll.u32 %s171_s10, 3  ;;  %s360_s12 = sshll.u32 %s552_s18, 7 }
  0x23   : > { %s772_s9 = scalar_select %p665_p9, 1, 0 }
  0x24   : > { %s678_s20 = scalar_lea.hbm %s757_s0, %s360_s12  ;;  %s175_s24 = scalar_lea.vmem [#allocation2], %s359_s11 }
  0x25   : > { %s182_s25 = sshll.u32 %s175_s24, 4  ;;  %p680_p11 = pnand %p392_p0, %p37_p3  ;;  %s183_s25 = int_to_ptr.vmem [resolvable:$true] %s182_s25 }
  0x26   : > { %s172_s28 = scalar_lea.sflag [#allocation3], %s171_s10  ;;  %s456_s29 = scalar_lea.hbm %s678_s20, 128 }
  0x27   : > { %p457_p12 = scmp.ne.s32.totalorder %s678_s20, %s456_s29  ;;  %p458_p13 = pneg %p680_p11 }
  0x28   : > { %s461_s6 = scalar_lea.hbm %s757_s0, 256  ;;  %p462_p10 = scmp.lt.s32.totalorder %s678_s20, %s757_s0 }
  0x29   : > { %p459_p5 = pnand %p458_p13, %p457_p12  ;;  %p463_p1 = scmp.lt.s32.totalorder %s461_s6, %s456_s29 }
  0x2b   : > { %p460_p7 = pneg %p459_p5  ;;  %p464_p2 = por %p463_p1, %p462_p10 }
  0x2d   : > { %p465_p0 = pnand %p464_p2, %p460_p7 }
  0x2f   : > { %468 = shalt.err (!%p465_p0)
}
  0x30   : > { %s469_s12 = scalar_lea.vmem %s183_s25, 128  ;;  %s555_s10 = smov [#allocation2]  }
  0x31   : > { %p470_p3 = scmp.ne.s32.totalorder %s183_s25, %s469_s12  ;;  %s474_s13 = sshll.u32 %s555_s10, 4  ;;  %s475_s13 = int_to_ptr.vmem [resolvable:$false] %s474_s13 }
  0x32   : > { %s476_s14 = scalar_lea.vmem %s475_s13, 256  ;;  %p477_p12 = scmp.lt.s32.totalorder %s183_s25, %s475_s13 }
  0x33   : > { %p472_p6 = pnand %p470_p3, %p458_p13  ;;  %p478_p5 = scmp.lt.s32.totalorder %s476_s14, %s469_s12 }
  0x35   : > { %p473_p9 = pneg %p472_p6  ;;  %p479_p4 = por %p478_p5, %p477_p12 }
  0x37   : > { %p480_p8 = pnand %p479_p4, %p473_p9 }
  0x39   : > { %483 = shalt.err (!%p480_p8)
}
  0x3a   : > { %386 = dma.hbm_to_vmem [thread:$0]  (!%p680_p11), %s678_s20, 128, %s183_s25, %s172_s28  }
  0x3b   : > { %p774_p7 = scmp.ne.s32.totalorder %s768_s23, 0 }
  0x3c   : > { %s701_s24 = sand.u32 (!%p774_p7), 1, %s544_s16   ;;  %p775_p6 = scmp.ne.s32.totalorder (!%p774_p7), %s766_s21, 0 }
  0x3d   : > { %191 = sbr.rel (%p774_p7) target bundleno = 394 (0x18a), region = 36  ;;  %s362_s29 = sshll.u32 (!%p774_p7), %s701_s24, 3 }
  0x3e   : > { %s194_s30 = scalar_lea.sflag (!%p774_p7), [#allocation3], %s701_s24  ;;  %s197_s5 = scalar_lea.vmem (!%p774_p7), [#allocation2], %s362_s29 }
  0x42   : > { %527 = dma.done.wait (%p775_p6), %s194_s30, 128  }
  0x43   : > { %529 = vsyncadd (%p775_p6), %s194_s30, 4294967168  ;;  %p776_p4 = scmp.eq.s32.totalorder %s603_s19, 0 }
  0x45   : > { %531 = dma.done.wait (%p776_p4), [#allocation6], 128   ;;  %p777_p8 = pmov %p776_p4 }
  0x46   : > { %vm229_vm0 = vcmask 261120   ;;  %v226_v0 = vld [vmem:[%s197_s5] sm:$0xff]  ;;  %v258_v15 = vld [vmem:[#allocation5] sm:$0xff]  ;;  %s368_s27 = sshll.u32 %s603_s19, 7  ;;  %s225_s28 = scalar_lea.vmem [#allocation7], %s362_s29 }
  0x47   : > { %533 = vsyncadd (%p777_p8), [#allocation6], 4294967168  ;;  %v230_v1 = vsel %vm229_vm0, %v226_v0, 0.0  ;;  %v365_v11 = vld [vmem:[%s759_s2] ss:$0 sm:$0xff]  ;;  %s275_s6 = sshll.u32 %s225_s28, 4  ;;  %s273_s12 = scalar_lea.hbm %s761_s4, %s368_s27  ;;  %s276_s6 = int_to_ptr.vmem [resolvable:$true] %s275_s6 }
  0x48   : > { %231 = vadd.xlane.f32.xlu0 %v230_v1  ;;  %v366_v13 = vld [vmem:[%s760_s3] ss:$0 sm:$0xff]  ;;  %s262_s10 = scalar_lea.sflag [#allocation4], %s701_s24  ;;  %s484_s13 = scalar_lea.vmem %s276_s6, 128 }
  0x49   : > { %p485_p9 = scmp.ne.s32.totalorder %s276_s6, %s484_s13  ;;  %p778_p11 = scmp.ne.s32.totalorder %s772_s9, 0 }
  0x4a   : > { %s556_s14 = smov [#allocation7]  }
  0x4b   : > { %p486_p13 = pnand %p485_p9, %p778_p11  ;;  %s488_s30 = sshll.u32 %s556_s14, 4  ;;  %s489_s30 = int_to_ptr.vmem [resolvable:$false] %s488_s30 }
  0x4c   : > { %s490_s19 = scalar_lea.vmem %s489_s30, 256  ;;  %p491_p1 = scmp.lt.s32.totalorder %s276_s6, %s489_s30 }
  0x4d   : > { %p487_p10 = pneg %p486_p13  ;;  %p492_p2 = scmp.lt.s32.totalorder %s490_s19, %s484_s13 }
  0x4f   : > { %p493_p0 = por %p492_p2, %p491_p1 }
  0x51   : > { %p494_p3 = pnand %p493_p0, %p487_p10 }
  0xd1   : > { %v232_v2 = vpop.xlane.xlu0 %231 }
  0xd2   : > { %v234_v3 = vmul.f32 0.03125, %v232_v2 }
  0xd4   : > { %v235_v4 = vsub.f32 %v226_v0, %v234_v3 }
  0xd6   : > { %v236_v5 = vmul.f32 %v235_v4, %v235_v4 }
  0xd8   : > { %v237_v6 = vsel %vm229_vm0, %v236_v5, 0.0 }
  0xd9   : > { %238 = vadd.xlane.f32.xlu0 %v237_v6 }
 0x162   : > { %v239_v7 = vpop.xlane.xlu0 %238 }
 0x163   : > { %v240_v8 = vmul.f32 0.03125, %v239_v7 }
 0x165   : > { %v241_v9 = vadd.f32 1e-05, %v240_v8 }
 0x167   : > { %428 = vrsqrt.f32 %v241_v9 }
 0x174   : > { %v429_v10 = vpop.eup %428 }
 0x175   : > { %v243_v12 = vmul.f32 %v429_v10, %v235_v4 }
 0x177   : > { %v250_v14 = vmul.f32 %v365_v11, %v243_v12 }
 0x179   : > { %v257_v16 = vadd.f32 %v366_v13, %v250_v14 }
 0x17b   : > { %v259_v17 = vadd.f32 %v258_v15, %v257_v16 }
 0x17d   : > { %260 = vst.msk [vmem:[%s225_s28] sm:$0xff] %vm229_vm0, %v259_v17 }
 0x17e   : > { %497 = shalt.err (!%p494_p3)
}
 0x17f   : > { %s498_s29 = scalar_lea.hbm %s273_s12, 128  ;;  %s502_s21 = scalar_lea.hbm %s761_s4, 256 }
 0x180   : > { %p499_p12 = scmp.ne.s32.totalorder %s273_s12, %s498_s29  ;;  %p503_p6 = scmp.lt.s32.totalorder %s273_s12, %s761_s4 }
 0x181   : > { %p504_p4 = scmp.lt.s32.totalorder %s502_s21, %s498_s29 }
 0x182   : > { %p500_p5 = pnand %p499_p12, %p778_p11 }
 0x183   : > { %p505_p8 = por %p504_p4, %p503_p6 }
 0x184   : > { %p501_p7 = pneg %p500_p5 }
 0x186   : > { %p506_p9 = pnand %p505_p8, %p501_p7 }
 0x188   : > { %509 = shalt.err (!%p506_p9)
}
 0x189   : > { %377 = dma.vmem_to_hbm [thread:$0]  (%p778_p11), %s276_s6, 128, %s273_s12, %s262_s10  }
 0x18a PF: > { %s287_s25 = sand.u32 1, %s540_s15   ;;  %p779_p13 = scmp.ne.s32.totalorder %s767_s22, 0 }
 0x18b   : > { %p780_p10 = scmp.ge.s32.totalorder %s552_s18, 2  ;;  %s288_s27 = scalar_lea.sflag [#allocation4], %s287_s25 }
 0x18d   : > { %p388_p1 = pnand %p780_p10, %p779_p13 }
 0x18f   : > { %p389_p2 = pneg %p388_p1 }
 0x191   : > { %535 = dma.done.wait (%p389_p2), %s288_s27, 128  }
 0x192   : > { %537 = vsyncadd (%p389_p2), %s288_s27, 4294967168  ;;  %p18_p0 = scmp.ge.s32.totalorder %s630_s26, 4   ;;  %s781_s15 = smov %s544_s16 }
 0x193   : > { %s782_s16 = smov %s548_s17  ;;  %s783_s17 = smov %s657_s8 }
 0x194   : > { %s784_s18 = smov %s630_s26  ;;  %20 = sbr.rel (!%p18_p0) target bundleno = 6 (0x6), region = 85 }
 0x199   :  { %293 = vsyncpa [#allocation3], 1 }
 0x19a   :  { %295 = vsyncpa [#allocation3 + $0x1], 1 }
 0x19b   :  { %296 = vsyncpa [#allocation6], 1 }
 0x19c   :  { %297 = vsyncpa [#allocation4], 1 }
 0x19d   :  { %299 = vsyncpa [#allocation4 + $0x1], 1 }

</bundles_post_ra>
